<compile_context>
chip_gen: v7x
topology: tpu7x:2x2x1
jax: 0.10.0
libtpu: 0.0.40
codegen_flags: <defaults>
</compile_context>

<pallas_src>
import jax
import jax.numpy as jnp
from jax.experimental import pallas as pl
from jax.experimental.pallas import tpu as pltpu


def _round_up(x, m):
    return ((x + m - 1) // m) * m


def _dqn_kernel(x_ref, w1_ref, b1_ref, w2_ref, b2_ref, w3_ref, b3_ref, o_ref):
    # x_ref: (2, TB) f32
    # w1:    (64, 2) f32     b1: (64, 1) f32
    # w2:    (128, 64) bf16  b2: (128, 1) f32
    # w3:    (8, 128) bf16 (rows 3..7 zero)   b3: (8, 1) f32 (rows 3..7 zero)
    # o_ref: (8, TB) f32
    x = x_ref[...]                                        # (2, TB)
    w1 = w1_ref[...]                                      # (64, 2)

    # Layer 1: Linear(2 -> 64) + tanh as two VPU rank-1 broadcast FMAs
    # (K=2 is far below the MXU contraction width; keep it on the VPU).
    h1 = jnp.tanh(
        w1[:, 0:1] * x[0:1, :]
        + w1[:, 1:2] * x[1:2, :]
        + b1_ref[...]
    )                                                     # (64, TB) f32

    # Layer 2: Linear(64 -> 128) + tanh on the MXU (bf16 operands, f32 acc).
    h2 = jnp.tanh(
        jnp.dot(w2_ref[...], h1.astype(jnp.bfloat16),
                preferred_element_type=jnp.float32)
        + b2_ref[...]
    )                                                     # (128, TB) f32

    # Layer 3: Linear(128 -> 8) (3 real + 5 zero-pad rows) -> unmasked full-tile store.
    o_ref[...] = (
        jnp.dot(w3_ref[...], h2.astype(jnp.bfloat16),
                preferred_element_type=jnp.float32)
        + b3_ref[...]
    )


def mountain_car_dqn_forward(x, params, *, block_b=4096):
    """x: (B, 2) float32.  params: W_i in PyTorch (out, in) layout, b_i (out, 1).
    Returns (B, 3) float32."""
    B = x.shape[0]
    w1 = params["W1"].astype(jnp.float32)
    b1 = params["b1"].astype(jnp.float32)
    w2 = params["W2"].astype(jnp.bfloat16)      # MXU operand
    b2 = params["b2"].astype(jnp.float32)
    w3 = params["W3"]
    b3 = params["b3"].astype(jnp.float32)

    # Pad the 3-row output layer to the native 8-sublane f32 tile.
    w3p = jnp.zeros((8, 128), jnp.bfloat16).at[:3, :].set(w3.astype(jnp.bfloat16))
    b3p = jnp.zeros((8, 1), jnp.float32).at[:3, :].set(b3)

    # Batch tile on the lane axis: big tiles amortize grid-step overhead; cap
    # at ceil(B/2) (rounded up to 128) so large batches give >=2 grid steps
    # ("parallel" axis -> both TensorCores on v7x).  Per-step footprint at
    # tb=4096 is ~4.5 MiB, far below every generation's VMEM.
    half = -(-B // 2)
    tb = max(128, min(block_b, _round_up(half, 128)))
    grid = pl.cdiv(B, tb)

    # One transpose (B,2)->(2,B); no explicit zero-pad copy -- Pallas pads the
    # partial last block and masks the writeback.
    xt = x.astype(jnp.float32).T

    full = lambda a: pl.BlockSpec(a.shape, lambda i: (0, 0))  # resident weights

    out_t = pl.pallas_call(
        _dqn_kernel,
        out_shape=jax.ShapeDtypeStruct((8, B), jnp.float32),
        grid=(grid,),
        in_specs=[
            pl.BlockSpec((2, tb), lambda i: (0, i)),   # x tile, pipelined
            full(w1), full(b1),
            full(w2), full(b2),
            full(w3p), full(b3p),
        ],
        out_specs=pl.BlockSpec((8, tb), lambda i: (0, i)),
        compiler_params=pltpu.CompilerParams(
            dimension_semantics=("parallel",),
            vmem_limit_bytes=32 << 20,
        ),
    )(xt, w1, b1, w2, b2, w3p, b3p)

    return out_t[:3, :].T                                  # (B, 3)


def init_params(key):
    """PyTorch Linear default init (uniform +-1/sqrt(fan_in)), native (out, in)
    weight layout, (out, 1) biases."""
    ks = jax.random.split(key, 6)

    def lin(kw, kb, fan_in, fan_out):
        bound = 1.0 / jnp.sqrt(jnp.float32(fan_in))
        W = jax.random.uniform(kw, (fan_out, fan_in), jnp.float32, -bound, bound)
        b = jax.random.uniform(kb, (fan_out, 1), jnp.float32, -bound, bound)
        return W, b

    W1, b1 = lin(ks[0], ks[1], 2, 64)
    W2, b2 = lin(ks[2], ks[3], 64, 128)
    W3, b3 = lin(ks[4], ks[5], 128, 3)
    return {"W1": W1, "b1": b1, "W2": W2, "b2": b2, "W3": W3, "b3": b3}


def reference_forward(x, p):
    # Exact f32 PyTorch semantics (kernel uses bf16 MXU operands, so compare
    # with a loosened tolerance).
    h1 = jnp.tanh(x @ p["W1"].T + p["b1"][:, 0])
    h2 = jnp.tanh(h1 @ p["W2"].T + p["b2"][:, 0])
    return h2 @ p["W3"].T + p["b3"][:, 0]


if __name__ == "__main__":
    key = jax.random.PRNGKey(0)
    k_params, k_x1, k_x2 = jax.random.split(key, 3)
    params = init_params(k_params)

    # Small batch: single grid step, partial (2,128)/(8,128) blocks.
    x_small = jax.random.normal(k_x1, (8, 2), jnp.float32)
    out_small = jax.block_until_ready(mountain_car_dqn_forward(x_small, params))
    ref_small = reference_forward(x_small, params)
    assert out_small.shape == (8, 3), out_small.shape
    assert jnp.allclose(out_small, ref_small, atol=5e-2, rtol=5e-2), (
        f"small-batch max abs err {jnp.max(jnp.abs(out_small - ref_small))}"
    )

    # Larger, non-multiple batch: multi-step 'parallel' grid + partial last block.
    x_big = jax.random.normal(k_x2, (1000, 2), jnp.float32)
    out_big = jax.block_until_ready(
        mountain_car_dqn_forward(x_big, params, block_b=256)
    )
    ref_big = reference_forward(x_big, params)
    assert out_big.shape == (1000, 3), out_big.shape
    assert jnp.allclose(out_big, ref_big, atol=5e-2, rtol=5e-2), (
        f"big-batch max abs err {jnp.max(jnp.abs(out_big - ref_big))}"
    )

    print("KERNEL_OK")
</pallas_src>

<mosaic_0001>
module attributes {stable_mosaic.version = 11 : i64} {
  func.func @_dqn_kernel(%arg0: i32, %arg1: memref<2x128xf32, #tpu.memory_space<vmem>>, %arg2: memref<64x2xf32, #tpu.memory_space<vmem>>, %arg3: memref<64x1xf32, #tpu.memory_space<vmem>>, %arg4: memref<128x64xbf16, #tpu.memory_space<vmem>>, %arg5: memref<128x1xf32, #tpu.memory_space<vmem>>, %arg6: memref<8x128xbf16, #tpu.memory_space<vmem>>, %arg7: memref<8x1xf32, #tpu.memory_space<vmem>>, %arg8: memref<8x128xf32, #tpu.memory_space<vmem>>) attributes {dimension_semantics = [#tpu.dimension_semantics<parallel>], iteration_bounds = array<i64: 1>, scalar_prefetch = 0 : i64, scratch_operands = 0 : i64, tpu.core_type = #tpu.core_type<tc>, window_params = [{transform_indices = @transform_0, window_bounds = array<i64: 2, 128>}, {pipeline_mode = #tpu.pipeline_mode<synchronous>, transform_indices = @transform_1, window_bounds = array<i64: 64, 2>}, {pipeline_mode = #tpu.pipeline_mode<synchronous>, transform_indices = @transform_2, window_bounds = array<i64: 64, 1>}, {pipeline_mode = #tpu.pipeline_mode<synchronous>, transform_indices = @transform_3, window_bounds = array<i64: 128, 64>}, {pipeline_mode = #tpu.pipeline_mode<synchronous>, transform_indices = @transform_4, window_bounds = array<i64: 128, 1>}, {pipeline_mode = #tpu.pipeline_mode<synchronous>, transform_indices = @transform_5, window_bounds = array<i64: 8, 128>}, {pipeline_mode = #tpu.pipeline_mode<synchronous>, transform_indices = @transform_6, window_bounds = array<i64: 8, 1>}, {transform_indices = @transform_7, window_bounds = array<i64: 8, 128>}]} {
    %c0 = arith.constant 0 : index
    %c0_0 = arith.constant 0 : index
    %0 = vector.load %arg1[%c0, %c0_0] : memref<2x128xf32, #tpu.memory_space<vmem>>, vector<2x128xf32>
    %c0_1 = arith.constant 0 : index
    %c0_2 = arith.constant 0 : index
    %1 = vector.load %arg2[%c0_1, %c0_2] : memref<64x2xf32, #tpu.memory_space<vmem>>, vector<64x2xf32>
    %2 = vector.extract_strided_slice %1 {offsets = [0, 0], sizes = [64, 1], strides = [1, 1]} : vector<64x2xf32> to vector<64x1xf32>
    %3 = vector.extract_strided_slice %0 {offsets = [0, 0], sizes = [1, 128], strides = [1, 1]} : vector<2x128xf32> to vector<1x128xf32>
    %4 = vector.broadcast %2 : vector<64x1xf32> to vector<64x128xf32>
    %5 = vector.broadcast %3 : vector<1x128xf32> to vector<64x128xf32>
    %6 = arith.mulf %4, %5 : vector<64x128xf32>
    %7 = vector.extract_strided_slice %1 {offsets = [0, 1], sizes = [64, 1], strides = [1, 1]} : vector<64x2xf32> to vector<64x1xf32>
    %8 = vector.extract_strided_slice %0 {offsets = [1, 0], sizes = [1, 128], strides = [1, 1]} : vector<2x128xf32> to vector<1x128xf32>
    %9 = vector.broadcast %7 : vector<64x1xf32> to vector<64x128xf32>
    %10 = vector.broadcast %8 : vector<1x128xf32> to vector<64x128xf32>
    %11 = arith.mulf %9, %10 : vector<64x128xf32>
    %12 = arith.addf %6, %11 : vector<64x128xf32>
    %c0_3 = arith.constant 0 : index
    %c0_4 = arith.constant 0 : index
    %13 = vector.load %arg3[%c0_3, %c0_4] : memref<64x1xf32, #tpu.memory_space<vmem>>, vector<64x1xf32>
    %14 = vector.broadcast %13 : vector<64x1xf32> to vector<64x128xf32>
    %15 = arith.addf %12, %14 : vector<64x128xf32>
    %16 = math.tanh %15 : vector<64x128xf32>
    %c0_5 = arith.constant 0 : index
    %c0_6 = arith.constant 0 : index
    %17 = vector.load %arg4[%c0_5, %c0_6] : memref<128x64xbf16, #tpu.memory_space<vmem>>, vector<128x64xbf16>
    %18 = arith.truncf %16 : vector<64x128xf32> to vector<64x128xbf16>
    %cst = arith.constant dense<0.000000e+00> : vector<128x128xf32>
    %19 = tpu.matmul %17, %18, %cst {dimension_numbers = #tpu.dot_dimension_numbers<[1], [0], [0], [1], [0, 0, 1, 1], [], []>} : vector<128x64xbf16>, vector<64x128xbf16>, vector<128x128xf32> -> vector<128x128xf32>
    %c0_7 = arith.constant 0 : index
    %c0_8 = arith.constant 0 : index
    %20 = vector.load %arg5[%c0_7, %c0_8] : memref<128x1xf32, #tpu.memory_space<vmem>>, vector<128x1xf32>
    %21 = vector.broadcast %20 : vector<128x1xf32> to vector<128x128xf32>
    %22 = arith.addf %19, %21 : vector<128x128xf32>
    %23 = math.tanh %22 : vector<128x128xf32>
    %c0_9 = arith.constant 0 : index
    %c0_10 = arith.constant 0 : index
    %24 = vector.load %arg6[%c0_9, %c0_10] : memref<8x128xbf16, #tpu.memory_space<vmem>>, vector<8x128xbf16>
    %25 = arith.truncf %23 : vector<128x128xf32> to vector<128x128xbf16>
    %cst_11 = arith.constant dense<0.000000e+00> : vector<8x128xf32>
    %26 = tpu.matmul %24, %25, %cst_11 {dimension_numbers = #tpu.dot_dimension_numbers<[1], [0], [0], [1], [0, 0, 1, 1], [], []>} : vector<8x128xbf16>, vector<128x128xbf16>, vector<8x128xf32> -> vector<8x128xf32>
    %c0_12 = arith.constant 0 : index
    %c0_13 = arith.constant 0 : index
    %27 = vector.load %arg7[%c0_12, %c0_13] : memref<8x1xf32, #tpu.memory_space<vmem>>, vector<8x1xf32>
    %28 = vector.broadcast %27 : vector<8x1xf32> to vector<8x128xf32>
    %29 = arith.addf %26, %28 : vector<8x128xf32>
    %c0_14 = arith.constant 0 : index
    %c0_15 = arith.constant 0 : index
    %30 = vector.load %arg8[%c0_14, %c0_15] : memref<8x128xf32, #tpu.memory_space<vmem>>, vector<8x128xf32>
    tpu.vector_store %arg8[%c0_14, %c0_15], %29 {strides = array<i32>} : memref<8x128xf32, #tpu.memory_space<vmem>>, vector<8x128xf32>,
    return
  }
  func.func @transform_0(%arg0: i32) -> (i32, i32) {
    %c0_i32 = arith.constant 0 : i32
    %c0_i32_0 = arith.constant 0 : i32
    return %c0_i32, %arg0 : i32, i32
  }
  func.func @transform_1(%arg0: i32) -> (i32, i32) {
    %c0_i32 = arith.constant 0 : i32
    %c0_i32_0 = arith.constant 0 : i32
    %c0_i32_1 = arith.constant 0 : i32
    return %c0_i32, %c0_i32_0 : i32, i32
  }
  func.func @transform_2(%arg0: i32) -> (i32, i32) {
    %c0_i32 = arith.constant 0 : i32
    %c0_i32_0 = arith.constant 0 : i32
    %c0_i32_1 = arith.constant 0 : i32
    return %c0_i32, %c0_i32_0 : i32, i32
  }
  func.func @transform_3(%arg0: i32) -> (i32, i32) {
    %c0_i32 = arith.constant 0 : i32
    %c0_i32_0 = arith.constant 0 : i32
    %c0_i32_1 = arith.constant 0 : i32
    return %c0_i32, %c0_i32_0 : i32, i32
  }
  func.func @transform_4(%arg0: i32) -> (i32, i32) {
    %c0_i32 = arith.constant 0 : i32
    %c0_i32_0 = arith.constant 0 : i32
    %c0_i32_1 = arith.constant 0 : i32
    return %c0_i32, %c0_i32_0 : i32, i32
  }
  func.func @transform_5(%arg0: i32) -> (i32, i32) {
    %c0_i32 = arith.constant 0 : i32
    %c0_i32_0 = arith.constant 0 : i32
    %c0_i32_1 = arith.constant 0 : i32
    return %c0_i32, %c0_i32_0 : i32, i32
  }
  func.func @transform_6(%arg0: i32) -> (i32, i32) {
    %c0_i32 = arith.constant 0 : i32
    %c0_i32_0 = arith.constant 0 : i32
    %c0_i32_1 = arith.constant 0 : i32
    return %c0_i32, %c0_i32_0 : i32, i32
  }
  func.func @transform_7(%arg0: i32) -> (i32, i32) {
    %c0_i32 = arith.constant 0 : i32
    %c0_i32_0 = arith.constant 0 : i32
    return %c0_i32, %arg0 : i32, i32
  }
}

</mosaic_0001>

<bundles_post_ra>
// kernel: tpu_custom_call.1
= control target key start
LH: loop header
LB: loop body
LE: loop exit
PB: predicated region body
PF: predicated region fallthrough
CT: control target
= control target key end

     0   :  { %v745_v2 = vmov 1   ;;  %v746_v7 = vmov 0   ;;  %s948_s0 = inlined_call_operand.vmem [shape: f32[2,8], index: 0, kind: input, shape index: {}]   ;;  %s949_s1 = inlined_call_operand.vmem [shape: f32[64,2], index: 1, kind: input, shape index: {}]   ;;  %s950_s2 = inlined_call_operand.vmem [shape: f32[64,1], index: 2, kind: input, shape index: {}]   ;;  %s951_s3 = inlined_call_operand.vmem [shape: bf16[128,64], index: 3, kind: input, shape index: {}]   ;;  %s952_s4 = inlined_call_operand.vmem [shape: f32[128,1], index: 4, kind: input, shape index: {}]   ;;  %s953_s5 = inlined_call_operand.vmem [shape: bf16[8,128], index: 5, kind: input, shape index: {}]   ;;  %s954_s6 = inlined_call_operand.vmem [shape: f32[8,1], index: 6, kind: input, shape index: {}]   ;;  %s955_s7 = inlined_call_operand.hbm [shape: f32[8,8], index: 7, kind: output, shape index: {}]  }
   0x1   :  { %v31_v0 = vld [vmem:[%s949_s1 + $0x10] sm:$0xff]  ;;  %v29_v1 = vld [vmem:[%s949_s1] sm:$0xff]  ;;  %657 = vset.pattern.permute.xlu0 %v745_v2  ;;  %655 = vset.pattern.permute.xlu1 %v745_v2  ;;  %v30_v4 = vld [vmem:[%s949_s1 + $0x8] sm:$0xff] }
   0x2   :  { %98 = vperm.xlu0 %657, %v31_v0   ;;  %90 = vperm.xlu1 %655, %v29_v1   ;;  %v33_v3 = vld [vmem:[%s949_s1 + $0x20] sm:$0xff]  ;;  %v35_v5 = vld [vmem:[%s949_s1 + $0x30] sm:$0xff]  ;;  %v32_v6 = vld [vmem:[%s949_s1 + $0x18] sm:$0xff] }
   0x6   :  { %106 = vperm.xlu0 %657, %v33_v3   ;;  %94 = vperm.xlu1 %655, %v30_v4  }
   0xa   :  { %114 = vperm.xlu0 %657, %v35_v5   ;;  %656 = vset.pattern.permute.xlu1 %v746_v7 }
   0xb   :  { %54 = vperm.xlu1 %656, %v32_v6  }
   0xe   :  { %662 = vset.pattern.permute.xlu0 %v746_v7 }
   0xf   :  { %39 = vperm.xlu0 %662, %v29_v1   ;;  %658 = vset.pattern.permute.xlu1 %v745_v2 }
  0x10   :  { %102 = vperm.xlu1 %658, %v32_v6  }
  0x11   :  { %12 = vsyncpa [#allocation3], 0  ;;  %v141_v8 = vld [vmem:[%s950_s2] sm:$0xff]  ;;  %v142_v9 = vld [vmem:[%s950_s2 + $0x8] sm:$0xff]  ;;  %vm361_vm0 = vcmask 523264   ;;  %v77_v38 = vlaneseq  ;;  %vm748_vm1 = vmmov 0  }
  0x12   :  { %v34_v10 = vld [vmem:[%s949_s1 + $0x28] sm:$0xff]  ;;  %v144_v11 = vld [vmem:[%s950_s2 + $0x18] sm:$0xff]  ;;  %v225_v13 = vld [vmem:[%s952_s4] sm:$0xff]  ;;  %s749_s10 = smov [#allocation2]  }
  0x13   :  { %44 = vperm.xlu0 %662, %v30_v4   ;;  %v146_v12 = vld [vmem:[%s950_s2 + $0x28] sm:$0xff]  ;;  %v143_v14 = vld [vmem:[%s950_s2 + $0x10] sm:$0xff]  ;;  %v229_v16 = vld [vmem:[%s952_s4 + $0x20] sm:$0xff]  ;;  %v78_v41 = vshrl.u32 %v77_v38, 7  ;;  %s561_s11 = sshll.u32 %s749_s10, 4  ;;  %s562_s11 = int_to_ptr.vmem [resolvable:$true] %s561_s11 }
  0x14   :  { %659 = vset.pattern.permute.xlu1 %v746_v7  ;;  %v227_v15 = vld [vmem:[%s952_s4 + $0x10] sm:$0xff]  ;;  %v36_v17 = vld [vmem:[%s949_s1 + $0x38] sm:$0xff]  ;;  %v233_v19 = vld [vmem:[%s952_s4 + $0x40] sm:$0xff]  ;;  %s721_s12 = scalar_lea.vmem %s562_s11, 128  ;;  %p726_p1 = scmp.lt.s32.totalorder %s562_s11, %s562_s11 }
  0x15   :  { %151 = vperm.xlu1 %659, %v141_v8   ;;  %v231_v18 = vld [vmem:[%s952_s4 + $0x30] sm:$0xff]  ;;  %v145_v20 = vld [vmem:[%s950_s2 + $0x20] sm:$0xff]  ;;  %v148_v24 = vld [vmem:[%s950_s2 + $0x38] sm:$0xff]  ;;  %v123_v44 = vsub.s32 1, %v78_v41  ;;  %v79_v45 = vsub.s32 0, %v78_v41  ;;  %p722_p0 = scmp.ne.s32.totalorder %s562_s11, %s721_s12  ;;  %p727_p2 = scmp.lt.s32.totalorder %s721_s12, %s721_s12 }
  0x16   :  { %v235_v21 = vld [vmem:[%s952_s4 + $0x50] sm:$0xff]  ;;  %v237_v23 = vld [vmem:[%s952_s4 + $0x60] sm:$0xff]  ;;  %v226_v26 = vld [vmem:[%s952_s4 + $0x8] sm:$0xff] }
  0x17   :  { %49 = vperm.xlu0 %662, %v31_v0   ;;  %v147_v22 = vld [vmem:[%s950_s2 + $0x30] sm:$0xff]  ;;  %v508_v27 = vld [vmem:[%s954_s6] sm:$0xff]  ;;  %v228_v28 = vld [vmem:[%s952_s4 + $0x18] sm:$0xff]  ;;  %p728_p3 = por %p727_p2, %p726_p1 }
  0x18   :  { %v239_v25 = vld [vmem:[%s952_s4 + $0x70] sm:$0xff]  ;;  %v230_v29 = vld [vmem:[%s952_s4 + $0x28] sm:$0xff]  ;;  %v232_v30 = vld [vmem:[%s952_s4 + $0x38] sm:$0xff] }
  0x19   :  { %59 = vperm.xlu1 %659, %v33_v3   ;;  %v665_v31 = vld [vmem:[%s951_s3] sm:$0xff]   ;;  %v234_v32 = vld [vmem:[%s952_s4 + $0x48] sm:$0xff]  ;;  %v236_v33 = vld [vmem:[%s952_s4 + $0x58] sm:$0xff]  ;;  %p729_p4 = pnand %p728_p3, %p722_p0 }
  0x1a   :  { %614 = vmatprep.mubr.msk.bf16.mxu0 %vm361_vm0, %v665_v31  ;;  %v238_v34 = vld [vmem:[%s952_s4 + $0x68] sm:$0xff]  ;;  %v240_v35 = vld [vmem:[%s952_s4 + $0x78] sm:$0xff]  ;;  %v28_v46 = vld [vmem:[%s948_s0] sm:$0x3] }
  0x1b   :  { %156 = vperm.xlu0 %662, %v142_v9   ;;  %v124_v49 = vrot.slane %v28_v46, %v123_v44  ;;  %v80_v50 = vrot.slane %v28_v46, %v79_v45 }
  0x1d   :  { %64 = vperm.xlu1 %659, %v34_v10  }
  0x1f   :  { %166 = vperm.xlu0 %662, %v144_v11  }
  0x21   :  { %660 = vset.pattern.permute.xlu1 %v745_v2 }
  0x22   :  { %110 = vperm.xlu1 %660, %v34_v10  }
  0x23   :  { %176 = vperm.xlu0 %662, %v146_v12  }
  0x26   :  { %661 = vset.pattern.permute.xlu1 %v746_v7 }
  0x27   :  { %243 = vperm.xlu0 %662, %v225_v13   ;;  %161 = vperm.xlu1 %661, %v143_v14  }
  0x2b   :  { %253 = vperm.xlu0 %662, %v227_v15   ;;  %69 = vperm.xlu1 %661, %v35_v5  }
  0x2f   :  { %263 = vperm.xlu0 %662, %v229_v16   ;;  %74 = vperm.xlu1 %661, %v36_v17  }
  0x33   :  { %273 = vperm.xlu0 %662, %v231_v18   ;;  %663 = vset.pattern.permute.xlu1 %v745_v2 }
  0x34   :  { %118 = vperm.xlu1 %663, %v36_v17  }
  0x37   :  { %283 = vperm.xlu0 %662, %v233_v19  }
  0x38   :  { %664 = vset.pattern.permute.xlu1 %v746_v7 }
  0x39   :  { %171 = vperm.xlu1 %664, %v145_v20  }
  0x3b   :  { %293 = vperm.xlu0 %662, %v235_v21  }
  0x3d   :  { %181 = vperm.xlu1 %664, %v147_v22  }
  0x3f   :  { %303 = vperm.xlu0 %662, %v237_v23  }
  0x41   :  { %186 = vperm.xlu1 %664, %v148_v24  }
  0x43   :  { %313 = vperm.xlu0 %662, %v239_v25  }
  0x45   :  { %248 = vperm.xlu1 %664, %v226_v26  }
  0x47   :  { %511 = vperm.xlu0 %662, %v508_v27  }
  0x49   :  { %258 = vperm.xlu1 %664, %v228_v28  }
  0x4d   :  { %268 = vperm.xlu1 %664, %v230_v29  }
  0x51   :  { %278 = vperm.xlu1 %664, %v232_v30  }
  0x55   :  { %288 = vperm.xlu1 %664, %v234_v32  }
  0x59   :  { %298 = vperm.xlu1 %664, %v236_v33  }
  0x5d   :  { %308 = vperm.xlu1 %664, %v238_v34  }
  0x61   :  { %318 = vperm.xlu1 %664, %v240_v35  }
  0x81   :  { %v91_v36 = vpop.permute.xlu1 %90  ;;  %v99_v37 = vpop.permute.xlu0 %98 }
  0x82   :  { %v125_v53 = vmul.f32 %v124_v49, %v91_v36  ;;  %v127_v3 = vmul.f32 %v124_v49, %v99_v37 }
  0x85   :  { %v95_v39 = vpop.permute.xlu1 %94  ;;  %v107_v40 = vpop.permute.xlu0 %106 }
  0x86   :  { %v126_v58 = vmul.f32 %v124_v49, %v95_v39  ;;  %v129_v22 = vmul.f32 %v124_v49, %v107_v40 }
  0x89   :  { %v115_v42 = vpop.permute.xlu0 %114 }
  0x8a   :  { %v55_v43 = vpop.permute.xlu1 %54  ;;  %v131_v32 = vmul.f32 %v124_v49, %v115_v42 }
  0x8b   :  { %v84_v2 = vmul.f32 %v80_v50, %v55_v43 }
  0x8e   :  { %v40_v47 = vpop.permute.xlu0 %39 }
  0x8f   :  { %v103_v48 = vpop.permute.xlu1 %102  ;;  %v81_v51 = vmul.f32 %v80_v50, %v40_v47  ;;  %v666_v47 = vld [vmem:[%s951_s3 + $0x8] sm:$0xff]  }
  0x90   :  { %v128_v1 = vmul.f32 %v124_v49, %v103_v48  ;;  %v667_v48 = vld [vmem:[%s951_s3 + $0x10] sm:$0xff]  }
  0x91   :  { %v133_v56 = vadd.f32 %v125_v53, %v81_v51  ;;  %v670_v51 = vld [vmem:[%s951_s3 + $0x28] sm:$0xff]   ;;  %v672_v53 = vld [vmem:[%s951_s3 + $0x38] sm:$0xff]  }
  0x92   :  { %v45_v52 = vpop.permute.xlu0 %44  ;;  %v136_v7 = vadd.f32 %v128_v1, %v84_v2 }
  0x93   :  { %v82_v55 = vmul.f32 %v80_v50, %v45_v52  ;;  %v671_v52 = vld [vmem:[%s951_s3 + $0x30] sm:$0xff]  }
  0x94   :  { %v152_v54 = vpop.permute.xlu1 %151 }
  0x95   :  { %v189_v59 = vadd.f32 %v152_v54, %v133_v56  ;;  %v134_v61 = vadd.f32 %v126_v58, %v82_v55  ;;  %v747_v54 = vmov 0.0  }
  0x96   :  { %v50_v57 = vpop.permute.xlu0 %49  ;;  %630 = vmatprep.subr.bf16.mxu1 %v747_v54  ;;  %646 = vmatprep.mubr.msk.bf16.mxu1 %vm748_vm1, %v747_v54 }
  0x97   :  { %673 = vtanh.f32 %v189_v59  ;;  %v83_v4 = vmul.f32 %v80_v50, %v50_v57 }
  0x98   :  { %v60_v60 = vpop.permute.xlu1 %59 }
  0x99   :  { %v135_v9 = vadd.f32 %v127_v3, %v83_v4  ;;  %v85_v23 = vmul.f32 %v80_v50, %v60_v60 }
  0x9a   :  { %v157_v62 = vpop.permute.xlu0 %156 }
  0x9b   :  { %v190_v63 = vadd.f32 %v157_v62, %v134_v61  ;;  %v137_v28 = vadd.f32 %v129_v22, %v85_v23 }
  0x9c   :  { %v65_v0 = vpop.permute.xlu1 %64 }
  0x9d   :  { %675 = vtanh.f32 %v190_v63  ;;  %v86_v18 = vmul.f32 %v80_v50, %v65_v0 }
  0x9e   :  { %v167_v5 = vpop.permute.xlu0 %166 }
  0x9f   :  { %v192_v8 = vadd.f32 %v167_v5, %v136_v7 }
  0xa1   :  { %v111_v6 = vpop.permute.xlu1 %110  ;;  %v674_v10 = vpop.eup %673  ;;  %677 = vtanh.f32 %v192_v8 }
  0xa2   :  { %v130_v16 = vmul.f32 %v124_v49, %v111_v6  ;;  %v177_v26 = vpop.permute.xlu0 %176 }
  0xa4   :  { %v138_v20 = vadd.f32 %v130_v16, %v86_v18 }
  0xa6   :  { %v162_v11 = vpop.permute.xlu1 %161  ;;  %v194_v27 = vadd.f32 %v177_v26, %v138_v20  ;;  %v244_v55 = vpop.permute.xlu0 %243 }
  0xa7   :  { %v676_v12 = vpop.eup %675  ;;  %v191_v13 = vadd.f32 %v162_v11, %v135_v9 }
  0xa8   :  { %v221_v14 = vpack.c.bf16 %v676_v12, %v674_v10 }
  0xa9   :  { %679 = vtanh.f32 %v191_v13 }
  0xaa   :  { %v70_v15 = vpop.permute.xlu1 %69  ;;  %606 = vmatprep.subr.bf16.mxu0 %v221_v14  ;;  %681 = vtanh.f32 %v194_v27  ;;  %v254_v57 = vpop.permute.xlu0 %253 }
  0xab   :  { %607 = vmatpush3.bf16.msra.mxu0 %v221_v14  ;;  %v678_v19 = vpop.eup %677  ;;  %v87_v29 = vmul.f32 %v80_v50, %v70_v15 }
  0xad   :  { %v139_v35 = vadd.f32 %v131_v32, %v87_v29 }
  0xae   :  { %v75_v17 = vpop.permute.xlu1 %74  ;;  %v264_v59 = vpop.permute.xlu0 %263 }
  0xaf   :  { %v88_v36 = vmul.f32 %v80_v50, %v75_v17  ;;  %v669_v50 = vld [vmem:[%s951_s3 + $0x20] sm:$0xff]  }
  0xb2   :  { %v274_v61 = vpop.permute.xlu0 %273 }
  0xb3   :  { %v680_v21 = vpop.eup %679  ;;  %v119_v24 = vpop.permute.xlu1 %118 }
  0xb4   :  { %v222_v25 = vpack.c.bf16 %v678_v19, %v680_v21  ;;  %v132_v33 = vmul.f32 %v124_v49, %v119_v24  ;;  %v682_v41 = vpop.eup %681  ;;  %v668_v49 = vld [vmem:[%s951_s3 + $0x18] sm:$0xff]  }
  0xb6   :  { %608 = vmatprep.subr.bf16.mxu0 %v222_v25  ;;  %v140_v38 = vadd.f32 %v132_v33, %v88_v36  ;;  %v284_v7 = vpop.permute.xlu0 %283 }
  0xb7   :  { %609 = vmatpush3.bf16.msra.mxu0 %v222_v25 }
  0xb8   :  { %v172_v30 = vpop.permute.xlu1 %171 }
  0xb9   :  { %v193_v31 = vadd.f32 %v172_v30, %v137_v28 }
  0xba   :  { %v294_v16 = vpop.permute.xlu0 %293 }
  0xbb   :  { %683 = vtanh.f32 %v193_v31 }
  0xbc   :  { %v182_v34 = vpop.permute.xlu1 %181 }
  0xbd   :  { %v195_v37 = vadd.f32 %v182_v34, %v139_v35 }
  0xbe   :  { %v304_v28 = vpop.permute.xlu0 %303 }
  0xbf   :  { %685 = vtanh.f32 %v195_v37 }
  0xc0   :  { %v187_v39 = vpop.permute.xlu1 %186 }
  0xc1   :  { %v196_v40 = vadd.f32 %v187_v39, %v140_v38 }
  0xc2   :  { %v314_v39 = vpop.permute.xlu0 %313 }
  0xc3   :  { %687 = vtanh.f32 %v196_v40 }
  0xc4   :  { %v249_v56 = vpop.permute.xlu1 %248 }
  0xc5   :  { %v684_v43 = vpop.eup %683 }
  0xc6   :  { %v223_v44 = vpack.c.bf16 %v682_v41, %v684_v43 }
  0xc8   :  { %610 = vmatprep.subr.bf16.mxu0 %v223_v44  ;;  %v259_v58 = vpop.permute.xlu1 %258 }
  0xc9   :  { %611 = vmatpush3.bf16.msra.mxu0 %v223_v44  ;;  %v686_v45 = vpop.eup %685 }
  0xcc   :  { %v269_v60 = vpop.permute.xlu1 %268 }
  0xcd   :  { %v688_v46 = vpop.eup %687 }
  0xce   :  { %v224_v42 = vpack.c.bf16 %v688_v46, %v686_v45 }
  0xd0   :  { %612 = vmatprep.subr.bf16.mxu0 %v224_v42  ;;  %v279_v1 = vpop.permute.xlu1 %278 }
  0xd1   :  { %613 = vmatpush3.bf16.msra.mxu0 %v224_v42 }
  0xd4   :  { %615 = vmatmul.mubr.msk.bf16.vlgmr.msra.gmra.mrb[0].mxu0 %vm361_vm0, %v666_v47  ;;  %v289_v8 = vpop.permute.xlu1 %288 }
  0xd5   :  { %618 = vmatprep.mubr.msk.bf16.mxu0 %vm361_vm0, %v667_v48 }
  0xd8   :  { %v299_v20 = vpop.permute.xlu1 %298 }
  0xdc   :  { %619 = vmatmul.mubr.msk.bf16.gmra.mrb[4].mxu0 %vm361_vm0, %v668_v49  ;;  %v309_v33 = vpop.permute.xlu1 %308 }
  0xdd   :  { %622 = vmatprep.mubr.msk.bf16.mxu0 %vm361_vm0, %v669_v50 }
  0xe0   :  { %v319_v46 = vpop.permute.xlu1 %318 }
  0xe4   :  { %623 = vmatmul.mubr.msk.bf16.gmra.mrb[8].mxu0 %vm361_vm0, %v670_v51 }
  0xe5   :  { %626 = vmatprep.mubr.msk.bf16.mxu0 %vm361_vm0, %v671_v52 }
  0xec   :  { %627 = vmatmul.mubr.msk.bf16.gmra.mrb[12].mxu0 %vm361_vm0, %v672_v53 }
 0x1a7   :  { %v616_v62 = vpop.f32.mrb[0].mxu0 }
 0x1a8   :  { %v429_v63 = vadd.f32 %v616_v62, %v254_v57  ;;  %v420_v0 = vpop.f32.mrb[1].mxu0 }
 0x1a9   :  { %v421_v2 = vadd.f32 %v420_v0, %v244_v55  ;;  %v617_v3 = vpop.f32.mrb[2].mxu0  ;;  %v499_v0 = vld [vmem:[%s953_s5] sm:$0xf] }
 0x1aa   :  { %689 = vtanh.f32 %v429_v63  ;;  %v432_v4 = vadd.f32 %v617_v3, %v259_v58  ;;  %v423_v5 = vpop.f32.mrb[3].mxu0 }
 0x1ab   :  { %691 = vtanh.f32 %v421_v2  ;;  %v424_v6 = vadd.f32 %v423_v5, %v249_v56 }
 0x1ac   :  { %693 = vtanh.f32 %v432_v4 }
 0x1ad   :  { %695 = vtanh.f32 %v424_v6 }
 0x1af   :  { %v620_v9 = vpop.f32.mrb[4].mxu0 }
 0x1b0   :  { %v445_v10 = vadd.f32 %v620_v9, %v274_v61  ;;  %v436_v11 = vpop.f32.mrb[5].mxu0 }
 0x1b1   :  { %v437_v12 = vadd.f32 %v436_v11, %v264_v59  ;;  %v621_v13 = vpop.f32.mrb[6].mxu0 }
 0x1b2   :  { %697 = vtanh.f32 %v445_v10  ;;  %v448_v14 = vadd.f32 %v621_v13, %v279_v1  ;;  %v439_v15 = vpop.f32.mrb[7].mxu0  ;;  %v512_v1 = vpop.permute.xlu0 %511 }
 0x1b3   :  { %699 = vtanh.f32 %v437_v12  ;;  %v440_v17 = vadd.f32 %v439_v15, %v269_v60 }
 0x1b4   :  { %v690_v18 = vpop.eup %689  ;;  %701 = vtanh.f32 %v448_v14 }
 0x1b5   :  { %v692_v19 = vpop.eup %691  ;;  %703 = vtanh.f32 %v440_v17 }
 0x1b6   :  { %v694_v21 = vpop.eup %693 }
 0x1b7   :  { %v696_v22 = vpop.eup %695  ;;  %v624_v23 = vpop.f32.mrb[8].mxu0  ;;  %v501_v24 = vpack.c.bf16 %v694_v21, %v690_v18 }
 0x1b8   :  { %v461_v25 = vadd.f32 %v624_v23, %v294_v16  ;;  %v452_v26 = vpop.f32.mrb[9].mxu0  ;;  %v500_v27 = vpack.c.bf16 %v696_v22, %v692_v19 }
 0x1b9   :  { %v453_v29 = vadd.f32 %v452_v26, %v284_v7  ;;  %v625_v30 = vpop.f32.mrb[10].mxu0 }
 0x1ba   :  { %705 = vtanh.f32 %v461_v25  ;;  %v464_v31 = vadd.f32 %v625_v30, %v299_v20  ;;  %v455_v32 = vpop.f32.mrb[11].mxu0  ;;  %631 = vmatpush3.bf16.msra.mxu1 %v500_v27 }
 0x1bb   :  { %707 = vtanh.f32 %v453_v29  ;;  %v456_v34 = vadd.f32 %v455_v32, %v289_v8  ;;  %632 = vmatprep.subr.bf16.mxu1 %v747_v54 }
 0x1bc   :  { %v698_v35 = vpop.eup %697  ;;  %709 = vtanh.f32 %v464_v31 }
 0x1bd   :  { %v700_v36 = vpop.eup %699  ;;  %711 = vtanh.f32 %v456_v34 }
 0x1be   :  { %v702_v37 = vpop.eup %701  ;;  %633 = vmatpush3.bf16.msra.mxu1 %v501_v24 }
 0x1bf   :  { %v704_v38 = vpop.eup %703  ;;  %v628_v40 = vpop.f32.mrb[12].mxu0  ;;  %634 = vmatprep.subr.bf16.mxu1 %v747_v54  ;;  %v503_v41 = vpack.c.bf16 %v702_v37, %v698_v35 }
 0x1c0   :  { %v477_v43 = vadd.f32 %v628_v40, %v314_v39  ;;  %v468_v44 = vpop.f32.mrb[13].mxu0  ;;  %v502_v45 = vpack.c.bf16 %v704_v38, %v700_v36 }
 0x1c1   :  { %v469_v42 = vadd.f32 %v468_v44, %v304_v28  ;;  %v629_v47 = vpop.f32.mrb[14].mxu0 }
 0x1c2   :  { %713 = vtanh.f32 %v477_v43  ;;  %v480_v48 = vadd.f32 %v629_v47, %v319_v46  ;;  %v471_v49 = vpop.f32.mrb[15].mxu0  ;;  %635 = vmatpush3.bf16.msra.mxu1 %v502_v45 }
 0x1c3   :  { %715 = vtanh.f32 %v469_v42  ;;  %v472_v50 = vadd.f32 %v471_v49, %v309_v33  ;;  %636 = vmatprep.subr.bf16.mxu1 %v747_v54 }
 0x1c4   :  { %v706_v51 = vpop.eup %705  ;;  %717 = vtanh.f32 %v480_v48 }
 0x1c5   :  { %v708_v52 = vpop.eup %707  ;;  %719 = vtanh.f32 %v472_v50 }
 0x1c6   :  { %v710_v53 = vpop.eup %709  ;;  %637 = vmatpush3.bf16.msra.mxu1 %v503_v41 }
 0x1c7   :  { %v712_v55 = vpop.eup %711  ;;  %638 = vmatprep.subr.bf16.mxu1 %v747_v54  ;;  %v505_v56 = vpack.c.bf16 %v710_v53, %v706_v51 }
 0x1c8   :  { %v504_v57 = vpack.c.bf16 %v712_v55, %v708_v52 }
 0x1ca   :  { %639 = vmatpush3.bf16.msra.mxu1 %v504_v57 }
 0x1cb   :  { %640 = vmatprep.subr.bf16.mxu1 %v747_v54 }
 0x1cc   :  { %v714_v58 = vpop.eup %713 }
 0x1cd   :  { %v716_v59 = vpop.eup %715 }
 0x1ce   :  { %v718_v60 = vpop.eup %717  ;;  %641 = vmatpush3.bf16.msra.mxu1 %v505_v56 }
 0x1cf   :  { %v720_v61 = vpop.eup %719  ;;  %642 = vmatprep.subr.bf16.mxu1 %v747_v54  ;;  %v507_v62 = vpack.c.bf16 %v718_v60, %v714_v58 }
 0x1d0   :  { %v506_v63 = vpack.c.bf16 %v720_v61, %v716_v59 }
 0x1d2   :  { %643 = vmatpush3.bf16.msra.mxu1 %v506_v63 }
 0x1d3   :  { %644 = vmatprep.subr.bf16.mxu1 %v747_v54 }
 0x1d6   :  { %645 = vmatpush3.bf16.msra.mxu1 %v507_v62 }
 0x1d9   :  { %647 = vmatmul.mubr.bf16.vlgmr.msra.gmra.mrb[0].mxu1 %v499_v0 }
 0x2ac   :  { %v548_v2 = vpop.f32.mrb[0].mxu1 }
 0x2ad   :  { %v549_v3 = vadd.f32 %v548_v2, %v512_v1  ;;  %v648_v4 = vpop.f32.mrb[1].mxu1 }
 0x2ae   :  { %v551_v5 = vpop.f32.mrb[2].mxu1 }
 0x2af   :  { %554 = vst [vmem:[#allocation2] sm:$0xff] %v549_v3  ;;  %v649_v6 = vpop.f32.mrb[3].mxu1 }
 0x2b0   :  { %732 = shalt.err (!%p729_p4)
}
 0x2b1   :  { %s733_s13 = scalar_lea.hbm %s955_s7, 128 }
 0x2b2   :  { %p734_p5 = scmp.ne.s32.totalorder %s955_s7, %s733_s13  ;;  %p737_p6 = scmp.lt.u32.totalorder %s733_s13, %s955_s7 }
 0x2b4   :  { %p739_p7 = pnand %p737_p6, %p734_p5 }
 0x2b6   :  { %742 = shalt.err (!%p739_p7)
}
 0x2b7   :  { %564 = dma.vmem_to_hbm [thread:$0]  %s562_s11, 128, %s955_s7, [#allocation3]  }
 0x2b8   :  { %743 = dma.done.wait [#allocation3], 128  }
 0x2b9   :  { %744 = vsyncadd [#allocation3], 4294967168 }
 0x2ba   :  { %568 = vsyncpa [#allocation3], 1 }

</bundles_post_ra>
